<compile_context>
chip_gen: v7x
topology: tpu7x:2x2x1
jax: 0.10.0
libtpu: 0.0.40
codegen_flags: <defaults>
</compile_context>

<pallas_src>
import functools

import jax
import jax.numpy as jnp
import numpy as np
from jax import lax
from jax.experimental import pallas as pl
from jax.experimental.pallas import tpu as pltpu

_EPS = 1e-5


def _split_attention_kernel(p_ref, w1_ref, wa1_ref, wa2_ref, pool_ref, bcast_ref,
                            ba2_ref, shift2_ref, out_ref, y_ref, *, radix, approx_recip):
  """One batch tile per grid step; every matmul is a plain 2-D MXU push.

  p_ref      (radix, Bt*L, Kp)   per-radix im2col patches; last lane == 1.0 (bias lane)
  w1_ref     (radix, Kp, C)      dense per-radix conv weights, BN1 scale folded,
                                 conv bias + BN1 shift in the last (ones) row
  wa1_ref    (C, inter)          BN2-folded block-diagonal 1x1 conv weights
  wa2_ref    (radix, inter, C)   radix-split block-diagonal 1x1 conv weights
  pool_ref   (Bt, Bt*L)          3x3 avg-pool expressed as a constant matmul
  bcast_ref  (Bt*L, Bt)          per-batch broadcast of attention weights
  ba2_ref    (radix, C)          attention conv #2 bias, remapped to radix-major order
  shift2_ref (1, inter)          BN2 shift with b_a1 folded in
  out_ref    (Bt*L, C)
  y_ref      (radix, Bt*L, C)    f32 VMEM scratch: post-ReLU radix-conv outputs
  """
  # ---- radix conv (+ folded BN1 + bias via ones lane + ReLU): dense per-radix matmuls.
  for r in range(radix):
    yr = jnp.dot(p_ref[r], w1_ref[r], preferred_element_type=jnp.float32)
    y_ref[r] = jnp.maximum(yr, 0.0)                                          # (Bt*L, C)

  # ---- sum over radix splits, then 3x3 avg pool (pooled spatial == 1) as a matmul.
  gap = y_ref[0]
  for r in range(1, radix):
    gap = gap + y_ref[r]
  pooled = jnp.dot(pool_ref[...], gap, preferred_element_type=jnp.float32)   # (Bt, C)

  # ---- attention MLP (grouped 1x1 convs folded into block-diagonal matmuls).
  h = jnp.dot(pooled, wa1_ref[...], preferred_element_type=jnp.float32)
  h = jnp.maximum(h + shift2_ref[...], 0.0)                                   # (Bt, inter)
  att = [jnp.dot(h, wa2_ref[r], preferred_element_type=jnp.float32)
         + ba2_ref[r:r + 1, :] for r in range(radix)]                         # radix x (Bt, C)

  # ---- rSoftMax: softmax over the radix axis, elementwise across radix-indexed tensors.
  m = att[0]
  for r in range(1, radix):
    m = jnp.maximum(m, att[r])
  ex = [jnp.exp(a - m) for a in att]
  den = ex[0]
  for r in range(1, radix):
    den = den + ex[r]
  inv = pl.reciprocal(den, approx=approx_recip)        # EUP slot; effectively free
  attw = [e * inv for e in ex]                         # radix x (Bt, C)

  # ---- attention-weighted sum of radix splits (broadcast to spatial via a matmul).
  bc = bcast_ref[...]
  out = jnp.dot(bc, attw[0], preferred_element_type=jnp.float32) * y_ref[0]
  for r in range(1, radix):
    out = out + jnp.dot(bc, attw[r], preferred_element_type=jnp.float32) * y_ref[r]
  out_ref[...] = out


def _vmem_bytes_estimate(bt, L, Kp, C, inter, radix, in_bytes):
  """Conservative per-step VMEM footprint (double-buffered blocks + scratch)."""
  rows = bt * L
  streamed = rows * (radix * Kp * in_bytes + C * 4)            # patch tile + f32 out tile
  resident = (radix * Kp * C * in_bytes                        # W1
              + C * inter * 4 + radix * inter * C * 4          # Wa1, Wa2
              + bt * rows * 4 + rows * bt * 4                  # pool, bcast
              + radix * C * 4 + inter * 4)                     # ba2, shift2
  scratch = radix * rows * C * 4                               # y scratch
  return 2 * (streamed + resident) + scratch                   # BlockSpec double-buffers


def _pick_batch_tile(B, L, Kp, C, inter, radix, in_bytes, *,
                     target_rows=256, vmem_budget=48 * 1024 * 1024):
  """Pick Bt: (Bt*L) rows divisible by 8 (or full batch), >= target rows when possible,
  >= 2 (ideally even) grid steps for the v7x two-TensorCore split, all under a VMEM
  budget sized for v7x's 64 MiB/TC (automatically safe on v5e/v6e's 128 MiB)."""
  legal = [bt for bt in range(1, B + 1)
           if B % bt == 0 and (bt == B or (bt * L) % 8 == 0)]
  fits = [bt for bt in legal
          if _vmem_bytes_estimate(bt, L, Kp, C, inter, radix, in_bytes) <= vmem_budget]
  cands = fits if fits else [min(legal, key=lambda bt: bt * L)]

  def key(bt):
    rows, steps = bt * L, B // bt
    return (rows >= target_rows,              # fill MXU M dim / amortize ~0.35us per step
            steps >= 2,                       # keep both v7x TensorCores busy
            steps == 1 or steps % 2 == 0,     # balanced 2-TC split
            -rows if rows >= target_rows else rows)

  return max(cands, key=key)


def split_attention(x, params, *, channels, kernel_size, radix=2, groups=1,
                    compute_dtype=jnp.bfloat16, approx_recip=True, target_rows=256):
  """Pallas implementation of SplitAttention.forward (stride=1, pad=0, dil=1)."""
  B, Cin, H, W = x.shape
  G = groups * radix
  kh = kw = kernel_size
  Ho, Wo = H - kh + 1, W - kw + 1
  L = Ho * Wo
  cpg = channels // groups            # conv output channels per group
  cin_pg = Cin // G                   # conv input channels per group
  Cpr = Cin // radix                  # input channels per radix split
  T = kh * kw
  Kr = Cpr * T                        # dense per-radix contraction width
  Kp = Kr + 1                         # +1 ones lane carrying the folded bias / BN shift
  inter = params['w_a1'].shape[0]
  inter_pg = inter // groups
  assert (Ho // 3) * (Wo // 3) == 1, "kernel implements the standard pooled-spatial==1 case"
  # TODO(synk): PyTorch's rSoftMax flattening artifact for pooled spatial > 1 is not
  # implemented; real usage has pooled spatial == 1.
  assert Cin % G == 0 and channels % groups == 0 and inter % groups == 0

  # ---- one-time host-side weight prep: fold BN + conv bias, bake group structure in.
  w_conv = np.asarray(params['w_conv'], np.float32)          # (C*radix, cin_pg, kh, kw)
  b_conv = np.asarray(params['b_conv'], np.float32)
  s1 = np.asarray(params['bn1_gamma'], np.float32) / np.sqrt(
      np.asarray(params['bn1_var'], np.float32) + _EPS)
  t1 = np.asarray(params['bn1_beta'], np.float32) - np.asarray(params['bn1_mean'], np.float32) * s1
  w_a1 = np.asarray(params['w_a1'], np.float32)[:, :, 0, 0]  # (inter, cpg)
  b_a1 = np.asarray(params['b_a1'], np.float32)
  s2 = np.asarray(params['bn2_gamma'], np.float32) / np.sqrt(
      np.asarray(params['bn2_var'], np.float32) + _EPS)
  t2 = np.asarray(params['bn2_beta'], np.float32) - np.asarray(params['bn2_mean'], np.float32) * s2
  w_a2 = np.asarray(params['w_a2'], np.float32)[:, :, 0, 0]  # (C*radix, inter_pg)
  b_a2 = np.asarray(params['b_a2'], np.float32)

  # Per-radix dense conv weights (radix, Kp, C): radix-level zero blocks of the grouped
  # conv are sliced away (radix-x fewer MXU FLOPs / weight bytes); only the groups-level
  # block structure remains. Row Kr (matched to the patch ones lane) carries bias + shift.
  W1 = np.zeros((radix, Kp, channels), np.float32)
  for r in range(radix):
    for c in range(channels):
      o = r * channels + c                       # radix-major conv output channel
      gr = c // cpg                              # group index within this radix split
      W1[r, gr * cin_pg * T:(gr + 1) * cin_pg * T, c] = (w_conv[o] * s1[o]).reshape(-1)
      W1[r, Kr, c] = t1[o] + s1[o] * b_conv[o]

  # attention 1x1 conv #1 (block-diagonal over groups), BN2 scale folded.
  Wa1 = np.zeros((channels, inter), np.float32)
  for mq in range(inter):
    gm = mq // inter_pg
    Wa1[gm * cpg:(gm + 1) * cpg, mq] = w_a1[mq] * s2[mq]
  shift2 = (t2 + s2 * b_a1).reshape(1, inter)

  # attention 1x1 conv #2, per-radix, cardinal-major -> radix-major channel remap.
  Wa2 = np.zeros((radix, inter, channels), np.float32)
  ba2 = np.zeros((radix, channels), np.float32)
  for r in range(radix):
    for c in range(channels):
      g = c // cpg
      q = g * radix * cpg + r * cpg + (c % cpg)   # cardinal-major attention channel
      Wa2[r, g * inter_pg:(g + 1) * inter_pg, c] = w_a2[q]
      ba2[r, c] = b_a2[q]

  # ---- batch tiling (sized against a v7x-safe VMEM budget) + constant pool / bcast mats.
  in_bytes = jnp.dtype(compute_dtype).itemsize
  Bt = _pick_batch_tile(B, L, Kp, channels, inter, radix, in_bytes, target_rows=target_rows)
  steps = B // Bt
  Pmat = np.zeros((Bt, Bt * L), np.float32)       # 3x3 avg pool (floor mode, pooled L == 1)
  for b in range(Bt):
    for di in range(3):
      for dj in range(3):
        Pmat[b, b * L + di * Wo + dj] = 1.0 / 9.0
  Bmat = np.zeros((Bt * L, Bt), np.float32)       # broadcast per-batch attention to its L rows
  for b in range(Bt):
    Bmat[b * L:(b + 1) * L, b] = 1.0

  # ---- per-radix im2col patches (radix, B*L, Kp): rows (batch, spatial)-major, lanes
  # (cin-within-radix, tap)-major, last lane == 1.0 so the bias rides the matmul.
  taps = []
  for di in range(kh):
    for dj in range(kw):
      taps.append(x[:, :, di:di + Ho, dj:dj + Wo])            # (B, Cin, Ho, Wo)
  p = jnp.stack(taps, axis=2)                                 # (B, Cin, T, Ho, Wo)
  p = p.reshape(B, radix, Cpr, T, Ho, Wo)
  p = p.transpose(1, 0, 4, 5, 2, 3).reshape(radix, B * L, Kr)
  p = jnp.concatenate([p, jnp.ones((radix, B * L, 1), p.dtype)], axis=-1)
  p = p.astype(compute_dtype)                     # big operand: bf16 by default

  W1j = jnp.asarray(W1, compute_dtype)            # big operand: bf16 by default
  Wa1j = jnp.asarray(Wa1, jnp.float32)            # tiny constants stay f32
  Wa2j = jnp.asarray(Wa2, jnp.float32)
  Pj = jnp.asarray(Pmat, jnp.float32)
  Bj = jnp.asarray(Bmat, jnp.float32)
  ba2j = jnp.asarray(ba2, jnp.float32)
  shift2j = jnp.asarray(shift2, jnp.float32)

  kernel = functools.partial(_split_attention_kernel, radix=radix,
                             approx_recip=bool(approx_recip))

  vmem_est = _vmem_bytes_estimate(Bt, L, Kp, channels, inter, radix, in_bytes)
  # >= 32 MiB so v5e never falls back to its 16 MiB scoped default; <= 48 MiB for v7x.
  vmem_limit = max(32 * 1024 * 1024, min(vmem_est + (4 << 20), 48 * 1024 * 1024))

  out2 = pl.pallas_call(
      kernel,
      out_shape=jax.ShapeDtypeStruct((B * L, channels), jnp.float32),
      grid_spec=pltpu.PrefetchScalarGridSpec(
          num_scalar_prefetch=0,
          grid=(steps,),
          in_specs=[
              pl.BlockSpec((radix, Bt * L, Kp), lambda b: (0, b, 0)),
              pl.BlockSpec((radix, Kp, channels), lambda b: (0, 0, 0)),
              pl.BlockSpec((channels, inter), lambda b: (0, 0)),
              pl.BlockSpec((radix, inter, channels), lambda b: (0, 0, 0)),
              pl.BlockSpec((Bt, Bt * L), lambda b: (0, 0)),
              pl.BlockSpec((Bt * L, Bt), lambda b: (0, 0)),
              pl.BlockSpec((radix, channels), lambda b: (0, 0)),
              pl.BlockSpec((1, inter), lambda b: (0, 0)),
          ],
          out_specs=pl.BlockSpec((Bt * L, channels), lambda b: (b, 0)),
          scratch_shapes=[pltpu.VMEM((radix, Bt * L, channels), jnp.float32)],
      ),
      compiler_params=pltpu.CompilerParams(
          dimension_semantics=("parallel",),        # batch tiles independent (v7x 2 TCs)
          vmem_limit_bytes=int(vmem_limit)),
  )(p, W1j, Wa1j, Wa2j, Pj, Bj, ba2j, shift2j)

  # back to PyTorch NCHW
  return out2.reshape(B, Ho, Wo, channels).transpose(0, 3, 1, 2)


def reference(x, params, *, channels, radix, groups):
  """Pure-JAX reference mirroring the PyTorch module (BN inference mode)."""
  eps = _EPS
  G = groups * radix
  dn = ('NCHW', 'OIHW', 'NCHW')
  y = lax.conv_general_dilated(x, params['w_conv'], (1, 1), 'VALID',
                               dimension_numbers=dn, feature_group_count=G)
  y = y + params['b_conv'][None, :, None, None]
  s1 = params['bn1_gamma'] / jnp.sqrt(params['bn1_var'] + eps)
  y = (y - params['bn1_mean'][None, :, None, None]) * s1[None, :, None, None] \
      + params['bn1_beta'][None, :, None, None]
  y = jnp.maximum(y, 0.0)
  splits = [y[:, r * channels:(r + 1) * channels] for r in range(radix)]
  gap = sum(splits)
  gap = lax.reduce_window(gap, 0.0, lax.add, (1, 1, 3, 3), (1, 1, 3, 3), 'VALID') / 9.0
  h = lax.conv_general_dilated(gap, params['w_a1'], (1, 1), 'VALID',
                               dimension_numbers=dn, feature_group_count=groups)
  h = h + params['b_a1'][None, :, None, None]
  s2 = params['bn2_gamma'] / jnp.sqrt(params['bn2_var'] + eps)
  h = (h - params['bn2_mean'][None, :, None, None]) * s2[None, :, None, None] \
      + params['bn2_beta'][None, :, None, None]
  h = jnp.maximum(h, 0.0)
  att = lax.conv_general_dilated(h, params['w_a2'], (1, 1), 'VALID',
                                 dimension_numbers=dn, feature_group_count=groups)
  att = att + params['b_a2'][None, :, None, None]
  Bsz = att.shape[0]
  a = att.reshape(Bsz, groups, radix, -1)
  a = jnp.swapaxes(a, 1, 2)
  a = jax.nn.softmax(a, axis=1)
  a = a.reshape(Bsz, -1, 1, 1)
  att_chunks = [a[:, i * channels:(i + 1) * channels] for i in range(radix)]
  return sum(ac * sp for ac, sp in zip(att_chunks, splits))


def make_params(key, in_channels, channels, kernel_size, radix, groups, reduction_factor):
  Crad = channels * radix
  G = groups * radix
  inter = max(32, in_channels * radix // reduction_factor)
  ks = jax.random.split(key, 14)
  return {
      'w_conv': 0.2 * jax.random.normal(ks[0], (Crad, in_channels // G, kernel_size, kernel_size), jnp.float32),
      'b_conv': 0.1 * jax.random.normal(ks[1], (Crad,), jnp.float32),
      'bn1_gamma': 1.0 + 0.1 * jax.random.normal(ks[2], (Crad,), jnp.float32),
      'bn1_beta': 0.1 * jax.random.normal(ks[3], (Crad,), jnp.float32),
      'bn1_mean': 0.1 * jax.random.normal(ks[4], (Crad,), jnp.float32),
      'bn1_var': 1.0 + 0.5 * jax.random.uniform(ks[5], (Crad,), jnp.float32),
      'w_a1': 0.2 * jax.random.normal(ks[6], (inter, channels // groups, 1, 1), jnp.float32),
      'b_a1': 0.1 * jax.random.normal(ks[7], (inter,), jnp.float32),
      'bn2_gamma': 1.0 + 0.1 * jax.random.normal(ks[8], (inter,), jnp.float32),
      'bn2_beta': 0.1 * jax.random.normal(ks[9], (inter,), jnp.float32),
      'bn2_mean': 0.1 * jax.random.normal(ks[10], (inter,), jnp.float32),
      'bn2_var': 1.0 + 0.5 * jax.random.uniform(ks[11], (inter,), jnp.float32),
      'w_a2': 0.2 * jax.random.normal(ks[12], (Crad, inter // groups, 1, 1), jnp.float32),
      'b_a2': 0.1 * jax.random.normal(ks[13], (Crad,), jnp.float32),
  }


if __name__ == "__main__":
  B, in_channels, H, W = 2, 8, 5, 5
  channels, kernel_size, radix, reduction_factor = 8, 3, 2, 4

  key = jax.random.PRNGKey(0)
  kp, kx = jax.random.split(key)
  x = jax.random.normal(kx, (B, in_channels, H, W), jnp.float32)

  # config 1 (strict): groups=1, f32 compute, exact reciprocal -> validates semantics.
  params1 = make_params(kp, in_channels, channels, kernel_size, radix, 1, reduction_factor)
  ref1 = reference(x, params1, channels=channels, radix=radix, groups=1)
  out_strict = jax.block_until_ready(
      split_attention(x, params1, channels=channels, kernel_size=kernel_size,
                      radix=radix, groups=1, compute_dtype=jnp.float32, approx_recip=False))
  np.testing.assert_allclose(np.asarray(out_strict), np.asarray(ref1), rtol=1e-4, atol=1e-4)

  # config 1, production defaults: bf16 patches / conv weights (halves the dominant HBM
  # stream, MXU-native bf16 with f32 accumulation) + approx EUP reciprocal. Loose
  # tolerance accounts for bf16 input rounding; semantics are validated by the strict runs.
  out_prod = jax.block_until_ready(
      split_attention(x, params1, channels=channels, kernel_size=kernel_size,
                      radix=radix, groups=1))
  np.testing.assert_allclose(np.asarray(out_prod), np.asarray(ref1), rtol=5e-2, atol=5e-2)

  # config 2 (strict, grouped): groups=2 validates the grouped / cardinal-major layout.
  params2 = make_params(jax.random.fold_in(kp, 1), in_channels, channels, kernel_size,
                        radix, 2, reduction_factor)
  ref2 = reference(x, params2, channels=channels, radix=radix, groups=2)
  out_g2 = jax.block_until_ready(
      split_attention(x, params2, channels=channels, kernel_size=kernel_size,
                      radix=radix, groups=2, compute_dtype=jnp.float32, approx_recip=False))
  np.testing.assert_allclose(np.asarray(out_g2), np.asarray(ref2), rtol=1e-4, atol=1e-4)

  print("KERNEL_OK")
</pallas_src>

<mosaic_0001>
module attributes {stable_mosaic.version = 11 : i64} {
  func.func @_split_attention_kernel(%arg0: i32, %arg1: memref<2x18x37xf32, #tpu.memory_space<vmem>>, %arg2: memref<2x37x8xf32, #tpu.memory_space<vmem>>, %arg3: memref<8x32xf32, #tpu.memory_space<vmem>>, %arg4: memref<2x32x8xf32, #tpu.memory_space<vmem>>, %arg5: memref<2x18xf32, #tpu.memory_space<vmem>>, %arg6: memref<18x2xf32, #tpu.memory_space<vmem>>, %arg7: memref<2x8xf32, #tpu.memory_space<vmem>>, %arg8: memref<1x32xf32, #tpu.memory_space<vmem>>, %arg9: memref<18x8xf32, #tpu.memory_space<vmem>>, %arg10: memref<2x18x8xf32, #tpu.memory_space<vmem>>) attributes {dimension_semantics = [#tpu.dimension_semantics<parallel>], iteration_bounds = array<i64: 1>, scalar_prefetch = 0 : i64, scratch_operands = 1 : i64, tpu.core_type = #tpu.core_type<tc>, window_params = [{transform_indices = @transform_0, window_bounds = array<i64: 2, 18, 37>}, {pipeline_mode = #tpu.pipeline_mode<synchronous>, transform_indices = @transform_1, window_bounds = array<i64: 2, 37, 8>}, {pipeline_mode = #tpu.pipeline_mode<synchronous>, transform_indices = @transform_2, window_bounds = array<i64: 8, 32>}, {pipeline_mode = #tpu.pipeline_mode<synchronous>, transform_indices = @transform_3, window_bounds = array<i64: 2, 32, 8>}, {pipeline_mode = #tpu.pipeline_mode<synchronous>, transform_indices = @transform_4, window_bounds = array<i64: 2, 18>}, {pipeline_mode = #tpu.pipeline_mode<synchronous>, transform_indices = @transform_5, window_bounds = array<i64: 18, 2>}, {pipeline_mode = #tpu.pipeline_mode<synchronous>, transform_indices = @transform_6, window_bounds = array<i64: 2, 8>}, {pipeline_mode = #tpu.pipeline_mode<synchronous>, transform_indices = @transform_7, window_bounds = array<i64: 1, 32>}, {transform_indices = @transform_8, window_bounds = array<i64: 18, 8>}]} {
    %c0 = arith.constant 0 : index
    %c0_0 = arith.constant 0 : index
    %c0_1 = arith.constant 0 : index
    %0 = vector.load %arg1[%c0, %c0_0, %c0_1] : memref<2x18x37xf32, #tpu.memory_space<vmem>>, vector<1x18x37xf32>
    %1 = vector.shape_cast %0 : vector<1x18x37xf32> to vector<18x37xf32>
    %c0_2 = arith.constant 0 : index
    %c0_3 = arith.constant 0 : index
    %c0_4 = arith.constant 0 : index
    %2 = vector.load %arg2[%c0_2, %c0_3, %c0_4] : memref<2x37x8xf32, #tpu.memory_space<vmem>>, vector<1x37x8xf32>
    %3 = vector.shape_cast %2 : vector<1x37x8xf32> to vector<37x8xf32>
    %cst = arith.constant dense<0.000000e+00> : vector<18x8xf32>
    %4 = tpu.matmul %1, %3, %cst {dimension_numbers = #tpu.dot_dimension_numbers<[1], [0], [0], [1], [0, 0, 1, 1], [], []>} : vector<18x37xf32>, vector<37x8xf32>, vector<18x8xf32> -> vector<18x8xf32>
    %cst_5 = arith.constant 0.000000e+00 : f32
    %5 = vector.broadcast %cst_5 : f32 to vector<18x8xf32>
    %6 = arith.maximumf %4, %5 : vector<18x8xf32>
    %c0_6 = arith.constant 0 : index
    %c0_7 = arith.constant 0 : index
    %c0_8 = arith.constant 0 : index
    %7 = vector.load %arg10[%c0_6, %c0_7, %c0_8] : memref<2x18x8xf32, #tpu.memory_space<vmem>>, vector<1x18x8xf32>
    %8 = vector.shape_cast %7 : vector<1x18x8xf32> to vector<18x8xf32>
    %9 = vector.shape_cast %6 : vector<18x8xf32> to vector<1x18x8xf32>
    tpu.vector_store %arg10[%c0_6, %c0_7, %c0_8], %9 {strides = array<i32>} : memref<2x18x8xf32, #tpu.memory_space<vmem>>, vector<1x18x8xf32>,
    %c1 = arith.constant 1 : index
    %c0_9 = arith.constant 0 : index
    %c0_10 = arith.constant 0 : index
    %10 = vector.load %arg1[%c1, %c0_9, %c0_10] : memref<2x18x37xf32, #tpu.memory_space<vmem>>, vector<1x18x37xf32>
    %11 = vector.shape_cast %10 : vector<1x18x37xf32> to vector<18x37xf32>
    %c1_11 = arith.constant 1 : index
    %c0_12 = arith.constant 0 : index
    %c0_13 = arith.constant 0 : index
    %12 = vector.load %arg2[%c1_11, %c0_12, %c0_13] : memref<2x37x8xf32, #tpu.memory_space<vmem>>, vector<1x37x8xf32>
    %13 = vector.shape_cast %12 : vector<1x37x8xf32> to vector<37x8xf32>
    %cst_14 = arith.constant dense<0.000000e+00> : vector<18x8xf32>
    %14 = tpu.matmul %11, %13, %cst_14 {dimension_numbers = #tpu.dot_dimension_numbers<[1], [0], [0], [1], [0, 0, 1, 1], [], []>} : vector<18x37xf32>, vector<37x8xf32>, vector<18x8xf32> -> vector<18x8xf32>
    %cst_15 = arith.constant 0.000000e+00 : f32
    %15 = vector.broadcast %cst_15 : f32 to vector<18x8xf32>
    %16 = arith.maximumf %14, %15 : vector<18x8xf32>
    %c1_16 = arith.constant 1 : index
    %c0_17 = arith.constant 0 : index
    %c0_18 = arith.constant 0 : index
    %17 = vector.load %arg10[%c1_16, %c0_17, %c0_18] : memref<2x18x8xf32, #tpu.memory_space<vmem>>, vector<1x18x8xf32>
    %18 = vector.shape_cast %17 : vector<1x18x8xf32> to vector<18x8xf32>
    %19 = vector.shape_cast %16 : vector<18x8xf32> to vector<1x18x8xf32>
    tpu.vector_store %arg10[%c1_16, %c0_17, %c0_18], %19 {strides = array<i32>} : memref<2x18x8xf32, #tpu.memory_space<vmem>>, vector<1x18x8xf32>,
    %c0_19 = arith.constant 0 : index
    %c0_20 = arith.constant 0 : index
    %c0_21 = arith.constant 0 : index
    %20 = vector.load %arg10[%c0_19, %c0_20, %c0_21] : memref<2x18x8xf32, #tpu.memory_space<vmem>>, vector<1x18x8xf32>
    %21 = vector.shape_cast %20 : vector<1x18x8xf32> to vector<18x8xf32>
    %c1_22 = arith.constant 1 : index
    %c0_23 = arith.constant 0 : index
    %c0_24 = arith.constant 0 : index
    %22 = vector.load %arg10[%c1_22, %c0_23, %c0_24] : memref<2x18x8xf32, #tpu.memory_space<vmem>>, vector<1x18x8xf32>
    %23 = vector.shape_cast %22 : vector<1x18x8xf32> to vector<18x8xf32>
    %24 = arith.addf %21, %23 : vector<18x8xf32>
    %c0_25 = arith.constant 0 : index
    %c0_26 = arith.constant 0 : index
    %25 = vector.load %arg5[%c0_25, %c0_26] : memref<2x18xf32, #tpu.memory_space<vmem>>, vector<2x18xf32>
    %cst_27 = arith.constant dense<0.000000e+00> : vector<2x8xf32>
    %26 = tpu.matmul %25, %24, %cst_27 {dimension_numbers = #tpu.dot_dimension_numbers<[1], [0], [0], [1], [0, 0, 1, 1], [], []>} : vector<2x18xf32>, vector<18x8xf32>, vector<2x8xf32> -> vector<2x8xf32>
    %c0_28 = arith.constant 0 : index
    %c0_29 = arith.constant 0 : index
    %27 = vector.load %arg3[%c0_28, %c0_29] : memref<8x32xf32, #tpu.memory_space<vmem>>, vector<8x32xf32>
    %cst_30 = arith.constant dense<0.000000e+00> : vector<2x32xf32>
    %28 = tpu.matmul %26, %27, %cst_30 {dimension_numbers = #tpu.dot_dimension_numbers<[1], [0], [0], [1], [0, 0, 1, 1], [], []>} : vector<2x8xf32>, vector<8x32xf32>, vector<2x32xf32> -> vector<2x32xf32>
    %c0_31 = arith.constant 0 : index
    %c0_32 = arith.constant 0 : index
    %29 = vector.load %arg8[%c0_31, %c0_32] : memref<1x32xf32, #tpu.memory_space<vmem>>, vector<1x32xf32>
    %30 = vector.broadcast %29 : vector<1x32xf32> to vector<2x32xf32>
    %31 = arith.addf %28, %30 : vector<2x32xf32>
    %cst_33 = arith.constant 0.000000e+00 : f32
    %32 = vector.broadcast %cst_33 : f32 to vector<2x32xf32>
    %33 = arith.maximumf %31, %32 : vector<2x32xf32>
    %c0_34 = arith.constant 0 : index
    %c0_35 = arith.constant 0 : index
    %c0_36 = arith.constant 0 : index
    %34 = vector.load %arg4[%c0_34, %c0_35, %c0_36] : memref<2x32x8xf32, #tpu.memory_space<vmem>>, vector<1x32x8xf32>
    %35 = vector.shape_cast %34 : vector<1x32x8xf32> to vector<32x8xf32>
    %cst_37 = arith.constant dense<0.000000e+00> : vector<2x8xf32>
    %36 = tpu.matmul %33, %35, %cst_37 {dimension_numbers = #tpu.dot_dimension_numbers<[1], [0], [0], [1], [0, 0, 1, 1], [], []>} : vector<2x32xf32>, vector<32x8xf32>, vector<2x8xf32> -> vector<2x8xf32>
    %c0_38 = arith.constant 0 : index
    %c0_39 = arith.constant 0 : index
    %37 = vector.load %arg7[%c0_38, %c0_39] : memref<2x8xf32, #tpu.memory_space<vmem>>, vector<1x8xf32>
    %38 = vector.broadcast %37 : vector<1x8xf32> to vector<2x8xf32>
    %39 = arith.addf %36, %38 : vector<2x8xf32>
    %c1_40 = arith.constant 1 : index
    %c0_41 = arith.constant 0 : index
    %c0_42 = arith.constant 0 : index
    %40 = vector.load %arg4[%c1_40, %c0_41, %c0_42] : memref<2x32x8xf32, #tpu.memory_space<vmem>>, vector<1x32x8xf32>
    %41 = vector.shape_cast %40 : vector<1x32x8xf32> to vector<32x8xf32>
    %cst_43 = arith.constant dense<0.000000e+00> : vector<2x8xf32>
    %42 = tpu.matmul %33, %41, %cst_43 {dimension_numbers = #tpu.dot_dimension_numbers<[1], [0], [0], [1], [0, 0, 1, 1], [], []>} : vector<2x32xf32>, vector<32x8xf32>, vector<2x8xf32> -> vector<2x8xf32>
    %c1_44 = arith.constant 1 : index
    %c0_45 = arith.constant 0 : index
    %43 = vector.load %arg7[%c1_44, %c0_45] : memref<2x8xf32, #tpu.memory_space<vmem>>, vector<1x8xf32>
    %44 = vector.broadcast %43 : vector<1x8xf32> to vector<2x8xf32>
    %45 = arith.addf %42, %44 : vector<2x8xf32>
    %46 = arith.maximumf %39, %45 : vector<2x8xf32>
    %47 = arith.subf %39, %46 : vector<2x8xf32>
    %48 = math.exp %47 : vector<2x8xf32>
    %49 = arith.subf %45, %46 : vector<2x8xf32>
    %50 = math.exp %49 : vector<2x8xf32>
    %51 = arith.addf %48, %50 : vector<2x8xf32>
    %52 = tpu.reciprocal %51 : vector<2x8xf32> -> vector<2x8xf32>
    %53 = arith.mulf %48, %52 : vector<2x8xf32>
    %54 = arith.mulf %50, %52 : vector<2x8xf32>
    %c0_46 = arith.constant 0 : index
    %c0_47 = arith.constant 0 : index
    %55 = vector.load %arg6[%c0_46, %c0_47] : memref<18x2xf32, #tpu.memory_space<vmem>>, vector<18x2xf32>
    %cst_48 = arith.constant dense<0.000000e+00> : vector<18x8xf32>
    %56 = tpu.matmul %55, %53, %cst_48 {dimension_numbers = #tpu.dot_dimension_numbers<[1], [0], [0], [1], [0, 0, 1, 1], [], []>} : vector<18x2xf32>, vector<2x8xf32>, vector<18x8xf32> -> vector<18x8xf32>
    %c0_49 = arith.constant 0 : index
    %c0_50 = arith.constant 0 : index
    %c0_51 = arith.constant 0 : index
    %57 = vector.load %arg10[%c0_49, %c0_50, %c0_51] : memref<2x18x8xf32, #tpu.memory_space<vmem>>, vector<1x18x8xf32>
    %58 = vector.shape_cast %57 : vector<1x18x8xf32> to vector<18x8xf32>
    %59 = arith.mulf %56, %58 : vector<18x8xf32>
    %cst_52 = arith.constant dense<0.000000e+00> : vector<18x8xf32>
    %60 = tpu.matmul %55, %54, %cst_52 {dimension_numbers = #tpu.dot_dimension_numbers<[1], [0], [0], [1], [0, 0, 1, 1], [], []>} : vector<18x2xf32>, vector<2x8xf32>, vector<18x8xf32> -> vector<18x8xf32>
    %c1_53 = arith.constant 1 : index
    %c0_54 = arith.constant 0 : index
    %c0_55 = arith.constant 0 : index
    %61 = vector.load %arg10[%c1_53, %c0_54, %c0_55] : memref<2x18x8xf32, #tpu.memory_space<vmem>>, vector<1x18x8xf32>
    %62 = vector.shape_cast %61 : vector<1x18x8xf32> to vector<18x8xf32>
    %63 = arith.mulf %60, %62 : vector<18x8xf32>
    %64 = arith.addf %59, %63 : vector<18x8xf32>
    %c0_56 = arith.constant 0 : index
    %c0_57 = arith.constant 0 : index
    %65 = vector.load %arg9[%c0_56, %c0_57] : memref<18x8xf32, #tpu.memory_space<vmem>>, vector<18x8xf32>
    tpu.vector_store %arg9[%c0_56, %c0_57], %64 {strides = array<i32>} : memref<18x8xf32, #tpu.memory_space<vmem>>, vector<18x8xf32>,
    return
  }
  func.func @transform_0(%arg0: i32) -> (i32, i32, i32) {
    %c0_i32 = arith.constant 0 : i32
    %c0_i32_0 = arith.constant 0 : i32
    %c0_i32_1 = arith.constant 0 : i32
    return %c0_i32, %arg0, %c0_i32_0 : i32, i32, i32
  }
  func.func @transform_1(%arg0: i32) -> (i32, i32, i32) {
    %c0_i32 = arith.constant 0 : i32
    %c0_i32_0 = arith.constant 0 : i32
    %c0_i32_1 = arith.constant 0 : i32
    %c0_i32_2 = arith.constant 0 : i32
    return %c0_i32, %c0_i32_0, %c0_i32_1 : i32, i32, i32
  }
  func.func @transform_2(%arg0: i32) -> (i32, i32) {
    %c0_i32 = arith.constant 0 : i32
    %c0_i32_0 = arith.constant 0 : i32
    %c0_i32_1 = arith.constant 0 : i32
    return %c0_i32, %c0_i32_0 : i32, i32
  }
  func.func @transform_3(%arg0: i32) -> (i32, i32, i32) {
    %c0_i32 = arith.constant 0 : i32
    %c0_i32_0 = arith.constant 0 : i32
    %c0_i32_1 = arith.constant 0 : i32
    %c0_i32_2 = arith.constant 0 : i32
    return %c0_i32, %c0_i32_0, %c0_i32_1 : i32, i32, i32
  }
  func.func @transform_4(%arg0: i32) -> (i32, i32) {
    %c0_i32 = arith.constant 0 : i32
    %c0_i32_0 = arith.constant 0 : i32
    %c0_i32_1 = arith.constant 0 : i32
    return %c0_i32, %c0_i32_0 : i32, i32
  }
  func.func @transform_5(%arg0: i32) -> (i32, i32) {
    %c0_i32 = arith.constant 0 : i32
    %c0_i32_0 = arith.constant 0 : i32
    %c0_i32_1 = arith.constant 0 : i32
    return %c0_i32, %c0_i32_0 : i32, i32
  }
  func.func @transform_6(%arg0: i32) -> (i32, i32) {
    %c0_i32 = arith.constant 0 : i32
    %c0_i32_0 = arith.constant 0 : i32
    %c0_i32_1 = arith.constant 0 : i32
    return %c0_i32, %c0_i32_0 : i32, i32
  }
  func.func @transform_7(%arg0: i32) -> (i32, i32) {
    %c0_i32 = arith.constant 0 : i32
    %c0_i32_0 = arith.constant 0 : i32
    %c0_i32_1 = arith.constant 0 : i32
    return %c0_i32, %c0_i32_0 : i32, i32
  }
  func.func @transform_8(%arg0: i32) -> (i32, i32) {
    %c0_i32 = arith.constant 0 : i32
    %c0_i32_0 = arith.constant 0 : i32
    return %arg0, %c0_i32 : i32, i32
  }
}

</mosaic_0001>

<bundles_post_ra>
// kernel: tpu_custom_call.1
= control target key start
LH: loop header
LB: loop body
LE: loop exit
PB: predicated region body
PF: predicated region fallthrough
CT: control target
= control target key end

     0   :  { %v995_v0 = vmov 0.0|0.0   ;;  %vm996_vm0 = vmmov 0   ;;  %v997_v8 = vmov 0.0   ;;  %vm47_vm1 = vcmask 1044480   ;;  %s1238_s1 = inlined_call_operand.vmem [shape: f32[2,37,8], index: 1, kind: input, shape index: {}]   ;;  %s1239_s0 = inlined_call_operand.vmem [shape: f32[2,18,37], index: 0, kind: input, shape index: {}]   ;;  %s1240_s2 = inlined_call_operand.vmem [shape: f32[8,32], index: 2, kind: input, shape index: {}]   ;;  %s1241_s4 = inlined_call_operand.vmem [shape: f32[2,18], index: 4, kind: input, shape index: {}]   ;;  %s1242_s3 = inlined_call_operand.vmem [shape: f32[2,32,8], index: 3, kind: input, shape index: {}]   ;;  %s1243_s7 = inlined_call_operand.vmem [shape: f32[1,32], index: 7, kind: input, shape index: {}]   ;;  %s1244_s6 = inlined_call_operand.vmem [shape: f32[2,8], index: 6, kind: input, shape index: {}]   ;;  %s1245_s5 = inlined_call_operand.vmem [shape: f32[18,2], index: 5, kind: input, shape index: {}]   ;;  %s1246_s8 = inlined_call_operand.vmem [shape: f32[18,8], index: 8, kind: output, shape index: {}]  }
   0x1   :  { %959 = vmatprep.subr.bf16.mxu0 %v995_v0  ;;  %965 = vmatprep.subr.bf16.mxu1 %v995_v0  ;;  %v32_v1 = vld [vmem:[%s1238_s1] sm:$0xff]  ;;  %v33_v2 = vld [vmem:[%s1238_s1 + $0x8] sm:$0xff]  ;;  %v795_v5 = vld [vmem:[%s1238_s1 + $0x30] sm:$0xff]  ;;  %vm37_vm2 = vcmask 302080   ;;  %vm134_vm3 = vcmask 64512   ;;  %vm137_vm4 = vcmask 58368  }
   0x2   :  { %v794_v3 = vld [vmem:[%s1238_s1 + $0x28] sm:$0xff]  ;;  %v960_v4 = vpack.c.bf16 %v33_v2, %v32_v1  ;;  %v34_v6 = vld [vmem:[%s1238_s1 + $0x10] sm:$0xff]  ;;  %v35_v7 = vld [vmem:[%s1238_s1 + $0x18] sm:$0xff]  ;;  %873 = vmatprep.mubr.msk.f32.mxu0 %vm996_vm0, %v997_v8  ;;  %892 = vmatprep.mubr.msk.f32.mxu1 %vm996_vm0, %v997_v8  ;;  %vm262_vm5 = vcmask 1041408   ;;  %vm258_vm6 = vcmask 146432   ;;  %vm427_vm7 = vcmask 261120  }
   0x3   :  { %v966_v9 = vpack.c.bf16 %v795_v5, %v794_v3  ;;  %v796_v10 = vld [vmem:[%s1238_s1 + $0x38] sm:$0xff]  ;;  %v797_v11 = vld [vmem:[%s1238_s1 + $0x40] sm:$0xff]  ;;  %v963_v12 = vpack.c.bf16 %v35_v7, %v34_v6  ;;  %v798_v15 = vld [vmem:[%s1238_s1 + $0x48] sm:$0x1f]  ;;  %vm595_vm8 = vcmask 15360  }
   0x4   :  { %961 = vmatpush3.bf16.msra.mxu0 %v960_v4  ;;  %v969_v13 = vpack.c.bf16 %v797_v11, %v796_v10  ;;  %v36_v14 = vld [vmem:[%s1238_s1 + $0x20] sm:$0x1f]  ;;  %v791_v17 = vld [vmem:[%s1239_s0 + $0x18] sm:$0xff]  ;;  %v30_v18 = vld [vmem:[%s1239_s0 + $0x8] sm:$0xff] }
   0x5   :  { %967 = vmatpush3.bf16.msra.mxu1 %v966_v9  ;;  %962 = vmatprep.subr.bf16.mxu0 %v995_v0  ;;  %v29_v16 = vld [vmem:[%s1239_s0] sm:$0xff]  ;;  %v31_v20 = vld [vmem:[%s1239_s0 + $0x10] sm:$0x3]  ;;  %v793_v21 = vld [vmem:[%s1239_s0 + $0x28] sm:$0x3] }
   0x6   :  { %968 = vmatprep.subr.bf16.mxu1 %v995_v0  ;;  %v792_v19 = vld [vmem:[%s1239_s0 + $0x20] sm:$0xff]  ;;  %v419_v53 = vld [vmem:[%s1242_s3 + $0x8] sm:$0xff]  ;;  %v420_v60 = vld [vmem:[%s1242_s3 + $0x10] sm:$0xff] }
   0x7   :  { %v336_v22 = vld [vmem:[%s1240_s2] sm:$0xff]  ;;  %v810_v56 = vld [vmem:[%s1242_s3 + $0x28] sm:$0xff]  ;;  %v421_v61 = vld [vmem:[%s1242_s3 + $0x18] sm:$0xff] }
   0x8   :  { %964 = vmatpush3.bf16.msra.mxu0 %v963_v12  ;;  %v257_v51 = vld [vmem:[%s1241_s4] sm:$0x3]  ;;  %v811_v62 = vld [vmem:[%s1242_s3 + $0x30] sm:$0xff]  ;;  %v978_v63 = vpack.c.bf16 %v421_v61, %v420_v60  ;;  %v812_v1 = vld [vmem:[%s1242_s3 + $0x38] sm:$0xff] }
   0x9   :  { %970 = vmatpush3.bf16.msra.mxu1 %v969_v13  ;;  %871 = vmatprep.subr.mxu0 %v997_v8  ;;  %v418_v52 = vld [vmem:[%s1242_s3] sm:$0xff]  ;;  %v984_v2 = vpack.c.bf16 %v812_v1, %v811_v62 }
   0xa   :  { %890 = vmatprep.subr.mxu1 %v997_v8  ;;  %v975_v54 = vpack.c.bf16 %v419_v53, %v418_v52  ;;  %v809_v55 = vld [vmem:[%s1242_s3 + $0x20] sm:$0xff] }
   0xb   :  { %v981_v57 = vpack.c.bf16 %v810_v56, %v809_v55  ;;  %v807_v7 = vld [vmem:[%s1244_s6] ss:$0 sm:$0xff]  ;;  %v813_v9 = vld [vmem:[%s1244_s6 + $0x1] ss:$0 sm:$0xff] }
   0xc   :  { %872 = vmatpush3.msk.msra.mxu0 %vm47_vm1, %v36_v14 }
   0xd   :  { %891 = vmatpush3.msk.msra.mxu1 %vm47_vm1, %v798_v15  ;;  %874 = vmatmul.mubr.msk.f32.vlgmr.msra.gmra.mrb[0].mxu0 %vm37_vm2, %v29_v16 }
   0xe   :  { %893 = vmatmul.mubr.msk.f32.vlgmr.msra.gmra.mrb[0].mxu1 %vm37_vm2, %v791_v17  ;;  %876 = vmatprep.mubr.msk.f32.mxu0 %vm996_vm0, %v997_v8 }
   0xf   :  { %895 = vmatprep.mubr.msk.f32.mxu1 %vm996_vm0, %v997_v8  ;;  %971 = vmatprep.subr.bf16.mxu0 %v995_v0 }
  0x10   :  { %910 = vmatprep.subr.mxu1 %v997_v8 }
  0x11   :  { %877 = vmatmul.mubr.msk.f32.gmra.mrb[2].mxu0 %vm37_vm2, %v30_v18  ;;  %911 = vmatpush3.msra.mxu1 %v336_v22 }
  0x12   :  { %896 = vmatmul.mubr.msk.f32.gmra.mrb[2].mxu1 %vm37_vm2, %v792_v19  ;;  %879 = vmatprep.mubr.msk.f32.mxu0 %vm996_vm0, %v997_v8 }
  0x13   :  { %898 = vmatprep.mubr.msk.f32.mxu1 %vm996_vm0, %v997_v8  ;;  %980 = vmatprep.subr.bf16.mxu1 %v995_v0 }
  0x15   :  { %880 = vmatmul.mubr.msk.f32.gmra.mrb[4].mxu0 %vm37_vm2, %v31_v20 }
  0x16   :  { %899 = vmatmul.mubr.msk.f32.gmra.mrb[4].mxu1 %vm37_vm2, %v793_v21  ;;  %907 = vmatprep.mubr.msk.f32.mxu0 %vm996_vm0, %v997_v8 }
  0x17   :  { %912 = vmatprep.mubr.msk.f32.mxu1 %vm996_vm0, %v997_v8 }
  0xe0   :  { %v117_v23 = vpop.f32.mrb[0].mxu0 }
  0xe1   :  { %v131_v24 = vmax.f32 %v117_v23, 0.0  ;;  %v227_v25 = vpop.f32.mrb[0].mxu1  ;;  %v875_v26 = vpop.f32.mrb[1].mxu0 }
  0xe2   :  { %v241_v27 = vmax.f32 %v227_v25, 0.0  ;;  %v894_v28 = vpop.f32.mrb[1].mxu1 }
  0xe3   :  { %135 = vst.msk [vmem:[#allocation2] sm:$0xff] %vm134_vm3, %v131_v24  ;;  %v593_v28 = vld [vmem:[%s1245_s5 + $0x8] sm:$0xff] }
  0xe4   :  { %245 = vst.msk [vmem:[#allocation2 + $0x18] sm:$0xff] %vm134_vm3, %v241_v27  ;;  %v122_v29 = vpop.f32.mrb[2].mxu0  ;;  %v592_v27 = vld [vmem:[%s1245_s5] sm:$0xff] }
  0xe5   :  { %v132_v30 = vmax.f32 %v122_v29, 0.0  ;;  %v232_v31 = vpop.f32.mrb[2].mxu1  ;;  %v878_v32 = vpop.f32.mrb[3].mxu0  ;;  %v594_v29 = vld [vmem:[%s1245_s5 + $0x10] sm:$0x3] }
  0xe6   :  { %v242_v33 = vmax.f32 %v232_v31, 0.0  ;;  %v897_v34 = vpop.f32.mrb[3].mxu1 }
  0xe7   :  { %136 = vst.msk [vmem:[#allocation2 + $0x8] sm:$0xff] %vm134_vm3, %v132_v30 }
  0xe8   :  { %246 = vst.msk [vmem:[#allocation2 + $0x20] sm:$0xff] %vm134_vm3, %v242_v33  ;;  %v127_v35 = vpop.f32.mrb[4].mxu0 }
  0xe9   :  { %v133_v36 = vmax.f32 %v127_v35, 0.0  ;;  %v237_v37 = vpop.f32.mrb[4].mxu1  ;;  %v881_v38 = vpop.f32.mrb[5].mxu0 }
  0xea   :  { %v243_v39 = vmax.f32 %v237_v37, 0.0  ;;  %v900_v40 = vpop.f32.mrb[5].mxu1  ;;  %v1131_v41 = vld [vmem:[#allocation2] sm:$0xff] }
  0xeb   :  { %138 = vst.msk [vmem:[#allocation2 + $0x10] sm:$0x3] %vm137_vm4, %v133_v36  ;;  %v1133_v42 = vld [vmem:[#allocation2 + $0x18] sm:$0xff] }
  0xec   :  { %247 = vst.msk [vmem:[#allocation2 + $0x28] sm:$0x3] %vm137_vm4, %v243_v39  ;;  %v254_v45 = vadd.f32 %v1133_v42, %v1131_v41 }
  0xee   :  { %v1135_v43 = vld [vmem:[#allocation2 + $0x8] sm:$0xff] }
  0xef   :  { %v1137_v44 = vld [vmem:[#allocation2 + $0x20] sm:$0xff] }
  0xf0   :  { %v255_v46 = vadd.f32 %v1137_v44, %v1135_v43 }
  0xf2   :  { %v972_v47 = vpack.c.bf16 %v255_v46, %v254_v45  ;;  %v1143_v48 = vld [vmem:[#allocation2 + $0x10] sm:$0x3] }
  0xf3   :  { %v1145_v49 = vld [vmem:[#allocation2 + $0x28] sm:$0x3] }
  0xf4   :  { %973 = vmatpush3.bf16.msra.mxu0 %v972_v47  ;;  %v256_v50 = vadd.f32 %v1145_v49, %v1143_v48 }
  0xf5   :  { %905 = vmatprep.subr.mxu0 %v997_v8 }
  0xf8   :  { %906 = vmatpush3.msk.msra.mxu0 %vm262_vm5, %v256_v50 }
  0xf9   :  { %908 = vmatmul.mubr.msk.f32.vlgmr.msra.gmra.mrb[6].mxu0 %vm258_vm6, %v257_v51  ;;  %974 = vmatprep.subr.bf16.mxu0 %v995_v0 }
  0xfa   :  { %923 = vmatprep.mubr.msk.f32.mxu0 %vm996_vm0, %v997_v8  ;;  %976 = vmatpush3.bf16.msra.mxu0 %v975_v54 }
  0xfb   :  { %977 = vmatprep.subr.bf16.mxu0 %v995_v0 }
  0xfe   :  { %979 = vmatpush3.bf16.msra.mxu0 %v978_v63 }
  0xff   :  { %937 = vmatprep.subr.mxu0 %v997_v8 }
 0x1cc   :  { %v332_v58 = vpop.f32.mrb[6].mxu0 }
 0x1cd   :  { %913 = vmatmul.mubr.msk.f32.vlgmr.msra.gmra.mrb[6].mxu1 %vm134_vm3, %v332_v58  ;;  %v909_v59 = vpop.f32.mrb[7].mxu0 }
 0x1ce   :  { %982 = vmatpush3.bf16.msra.mxu1 %v981_v57  ;;  %934 = vmatprep.mubr.msk.f32.mxu1 %vm996_vm0, %v997_v8 }
 0x1cf   :  { %983 = vmatprep.subr.bf16.mxu1 %v995_v0  ;;  %v805_v0 = vld [vmem:[%s1243_s7] ss:$0 sm:$0xff] }
 0x1d2   :  { %985 = vmatpush3.bf16.msra.mxu1 %v984_v2 }
 0x1d3   :  { %948 = vmatprep.subr.mxu1 %v997_v8 }
 0x2a0   :  { %v413_v3 = vpop.f32.mrb[6].mxu1 }
 0x2a1   :  { %v414_v4 = vadd.f32 %v805_v0, %v413_v3  ;;  %v914_v5 = vpop.f32.mrb[7].mxu1 }
 0x2a3   :  { %v417_v6 = vmax.f32 %v414_v4, 0.0 }
 0x2a5   :  { %924 = vmatmul.mubr.msk.f32.vlgmr.msra.gmra.mrb[8].mxu0 %vm427_vm7, %v417_v6  ;;  %935 = vmatmul.mubr.msk.f32.vlgmr.msra.gmra.mrb[8].mxu1 %vm427_vm7, %v417_v6 }
 0x2a6   :  { %939 = vmatprep.mubr.msk.f32.mxu0 %vm996_vm0, %v997_v8  ;;  %950 = vmatprep.mubr.msk.f32.mxu1 %vm996_vm0, %v997_v8 }
 0x378   :  { %v497_v10 = vpop.f32.mrb[8].mxu0  ;;  %v577_v11 = vpop.f32.mrb[8].mxu1 }
 0x379   :  { %v498_v12 = vadd.f32 %v807_v7, %v497_v10  ;;  %v578_v13 = vadd.f32 %v813_v9, %v577_v11  ;;  %v925_v14 = vpop.f32.mrb[9].mxu0  ;;  %v936_v15 = vpop.f32.mrb[9].mxu1 }
 0x37b   :  { %v581_v16 = vmax.f32 %v498_v12, %v578_v13 }
 0x37d   :  { %v582_v17 = vsub.f32 %v498_v12, %v581_v16  ;;  %v585_v18 = vsub.f32 %v578_v13, %v581_v16 }
 0x37f   :  { %v583_v19 = vmul.f32 1.442695, %v582_v17  ;;  %v586_v20 = vmul.f32 1.442695, %v585_v18 }
 0x381   :  { %989 = vpow2.f32 %v583_v19 }
 0x382   :  { %991 = vpow2.f32 %v586_v20 }
 0x38b   :  { %v990_v21 = vpop.eup %989 }
 0x38c   :  { %v992_v22 = vpop.eup %991 }
 0x38d   :  { %v588_v23 = vadd.f32 %v992_v22, %v990_v21 }
 0x38f   :  { %993 = vrcp.f32 %v588_v23 }
 0x399   :  { %v994_v24 = vpop.eup %993 }
 0x39a   :  { %v590_v25 = vmul.f32 %v994_v24, %v990_v21  ;;  %v591_v26 = vmul.f32 %v994_v24, %v992_v22 }
 0x39c   :  { %938 = vmatpush3.msk.msra.mxu0 %vm262_vm5, %v590_v25  ;;  %949 = vmatpush3.msk.msra.mxu1 %vm262_vm5, %v591_v26 }
 0x39d   :  { %940 = vmatmul.mubr.msk.f32.vlgmr.msra.gmra.mrb[10].mxu0 %vm595_vm8, %v592_v27  ;;  %951 = vmatmul.mubr.msk.f32.vlgmr.msra.gmra.mrb[10].mxu1 %vm595_vm8, %v592_v27 }
 0x39e   :  { %942 = vmatprep.mubr.msk.f32.mxu0 %vm996_vm0, %v997_v8  ;;  %953 = vmatprep.mubr.msk.f32.mxu1 %vm996_vm0, %v997_v8 }
 0x3a1   :  { %943 = vmatmul.mubr.msk.f32.gmra.mrb[12].mxu0 %vm595_vm8, %v593_v28  ;;  %954 = vmatmul.mubr.msk.f32.gmra.mrb[12].mxu1 %vm595_vm8, %v593_v28 }
 0x3a2   :  { %945 = vmatprep.mubr.msk.f32.mxu0 %vm996_vm0, %v997_v8  ;;  %956 = vmatprep.mubr.msk.f32.mxu1 %vm996_vm0, %v997_v8 }
 0x3a5   :  { %946 = vmatmul.mubr.msk.f32.gmra.mrb[14].mxu0 %vm595_vm8, %v594_v29  ;;  %957 = vmatmul.mubr.msk.f32.gmra.mrb[14].mxu1 %vm595_vm8, %v594_v29 }
 0x470   :  { %v674_v30 = vpop.f32.mrb[10].mxu0  ;;  %v760_v31 = vpop.f32.mrb[10].mxu1 }
 0x471   :  { %v688_v32 = vmul.f32 %v674_v30, %v1131_v41  ;;  %v774_v33 = vmul.f32 %v760_v31, %v1133_v42  ;;  %v941_v34 = vpop.f32.mrb[11].mxu0  ;;  %v952_v35 = vpop.f32.mrb[11].mxu1 }
 0x473   :  { %v777_v36 = vadd.f32 %v774_v33, %v688_v32 }
 0x474   :  { %v679_v37 = vpop.f32.mrb[12].mxu0  ;;  %v765_v38 = vpop.f32.mrb[12].mxu1 }
 0x475   :  { %780 = vst.msk [vmem:[%s1246_s8] sm:$0xff] %vm134_vm3, %v777_v36  ;;  %v689_v8 = vmul.f32 %v679_v37, %v1135_v43  ;;  %v775_v39 = vmul.f32 %v765_v38, %v1137_v44  ;;  %v944_v40 = vpop.f32.mrb[13].mxu0  ;;  %v955_v45 = vpop.f32.mrb[13].mxu1 }
 0x477   :  { %v778_v46 = vadd.f32 %v775_v39, %v689_v8 }
 0x478   :  { %v684_v41 = vpop.f32.mrb[14].mxu0  ;;  %v770_v47 = vpop.f32.mrb[14].mxu1 }
 0x479   :  { %781 = vst.msk [vmem:[%s1246_s8 + $0x8] sm:$0xff] %vm134_vm3, %v778_v46  ;;  %v690_v42 = vmul.f32 %v684_v41, %v1143_v48  ;;  %v776_v50 = vmul.f32 %v770_v47, %v1145_v49  ;;  %v947_v51 = vpop.f32.mrb[15].mxu0  ;;  %v958_v52 = vpop.f32.mrb[15].mxu1 }
 0x47b   :  { %v779_v53 = vadd.f32 %v776_v50, %v690_v42 }
 0x47d   :  { %782 = vst.msk [vmem:[%s1246_s8 + $0x10] sm:$0x3] %vm137_vm4, %v779_v53 }

</bundles_post_ra>
